<compile_context>
chip_gen: v7x
topology: tpu7x:2x2x1
jax: 0.10.0
libtpu: 0.0.40
codegen_flags: <defaults>
</compile_context>

<pallas_src>
import functools

import jax
import jax.numpy as jnp
from jax.experimental import pallas as pl
from jax.experimental.pallas import tpu as pltpu


_SQRT_2_OVER_PI = 0.7978845608028654


# ----------------------------------------------------------------------------
# The wrapped function `fn` (the thing Apply(fn) would call): tanh-approx GELU.
# ----------------------------------------------------------------------------
def _gelu_tanh(x):
    c = jnp.asarray(_SQRT_2_OVER_PI, dtype=x.dtype)
    coef = jnp.asarray(0.044715, dtype=x.dtype)
    half = jnp.asarray(0.5, dtype=x.dtype)
    one = jnp.asarray(1.0, dtype=x.dtype)
    return half * x * (one + jnp.tanh(c * (x + coef * x * x * x)))


def _apply_kernel(x_ref, o_ref, *, compute_dtype):
    # Elementwise: load the whole VMEM tile, apply fn, store.
    x = x_ref[...].astype(compute_dtype)
    o_ref[...] = _gelu_tanh(x).astype(o_ref.dtype)


def _bf16_compute_ok():
    """bf16 VPU/EUP exists on v6e/v7x; keep f32 compute elsewhere."""
    try:
        kind = jax.devices()[0].device_kind.lower()
    except Exception:
        return False
    return ("v6" in kind) or ("v7" in kind)


@functools.partial(jax.jit, static_argnames=("detach",))
def apply_module(x, detach=False):
    """JAX/Pallas equivalent of Apply(fn=gelu, detach=detach).forward(x)."""
    orig_shape = x.shape
    orig_dtype = x.dtype
    n = x.size

    if orig_dtype == jnp.bfloat16 and _bf16_compute_ok():
        compute_dtype = jnp.bfloat16
    else:
        compute_dtype = jnp.float32

    # ---- choose a lane-dense 2D slab (rows, lanes); avoid padding whenever
    #      n already divides one of the candidate lane widths (common case) ----
    lanes = None
    for cand in (1024, 512, 256, 128):
        if n % cand == 0:
            lanes = cand
            break
    padded = lanes is None
    if padded:
        lanes = 128

    x_flat = jnp.reshape(x, (-1,))
    if padded:
        # Only the ragged tail (< 128 elements) is padded.
        n_pad = ((n + lanes - 1) // lanes) * lanes
        x_flat = jnp.pad(x_flat, (0, n_pad - n))
    else:
        n_pad = n
    rows = n_pad // lanes
    x2d = jnp.reshape(x_flat, (rows, lanes))

    # ---- block sizing: ~2 MiB blocks; sublane multiple per dtype packing ----
    itemsize = jnp.dtype(orig_dtype).itemsize
    sub = max(8, 32 // max(itemsize, 1))  # f32 -> 8, bf16 -> 16, int8 -> 32
    target_block_bytes = 2 * 1024 * 1024
    target_rows = max(sub, (target_block_bytes // (lanes * itemsize)) // sub * sub)

    # Keep the grid >= 8 steps when there is enough data (v7x: 2 TensorCores
    # share the "parallel" axis).
    min_grid = 8
    rows_for_min_grid = -(-rows // min_grid)                     # cdiv
    rows_for_min_grid = max(sub, -(-rows_for_min_grid // sub) * sub)

    block_rows = min(target_rows, rows_for_min_grid)
    if block_rows >= rows:
        block_rows = rows  # single full-extent block (always a legal tile)
    grid = (pl.cdiv(rows, block_rows),)  # Pallas masks the ragged last block

    kernel = functools.partial(_apply_kernel, compute_dtype=compute_dtype)
    out2d = pl.pallas_call(
        kernel,
        out_shape=jax.ShapeDtypeStruct((rows, lanes), orig_dtype),
        grid=grid,
        in_specs=[pl.BlockSpec((block_rows, lanes), lambda i: (i, 0))],
        out_specs=pl.BlockSpec((block_rows, lanes), lambda i: (i, 0)),
        compiler_params=pltpu.CompilerParams(
            dimension_semantics=("parallel",),
        ),
    )(x2d)

    if padded:
        out = jnp.reshape(out2d, (-1,))[:n].reshape(orig_shape)
    else:
        out = jnp.reshape(out2d, orig_shape)

    if detach:
        # torch .detach() -> stop_gradient (forward value unchanged)
        out = jax.lax.stop_gradient(out)
    return out


if __name__ == "__main__":
    key = jax.random.PRNGKey(0)
    # Small NCHW input consistent with a conv-style usage of Apply.
    x = jax.random.normal(key, (2, 4, 16, 16), dtype=jnp.float32)

    out = apply_module(x, detach=True)
    out = jax.block_until_ready(out)

    # Sanity check against plain-JAX reference of the wrapped fn.
    ref = 0.5 * x * (1.0 + jnp.tanh(_SQRT_2_OVER_PI * (x + 0.044715 * x**3)))
    assert out.shape == x.shape and out.dtype == x.dtype
    assert jnp.max(jnp.abs(out - ref)) < 1e-5

    print("KERNEL_OK")
</pallas_src>

<mosaic_0001>
module attributes {stable_mosaic.version = 11 : i64} {
  func.func @_apply_kernel(%arg0: i32, %arg1: memref<2x1024xf32, #tpu.memory_space<vmem>>, %arg2: memref<2x1024xf32, #tpu.memory_space<vmem>>) attributes {dimension_semantics = [#tpu.dimension_semantics<parallel>], iteration_bounds = array<i64: 1>, scalar_prefetch = 0 : i64, scratch_operands = 0 : i64, tpu.core_type = #tpu.core_type<tc>, window_params = [{transform_indices = @transform_0, window_bounds = array<i64: 2, 1024>}, {transform_indices = @transform_1, window_bounds = array<i64: 2, 1024>}]} {
    %c0 = arith.constant 0 : index
    %c0_0 = arith.constant 0 : index
    %0 = vector.load %arg1[%c0, %c0_0] : memref<2x1024xf32, #tpu.memory_space<vmem>>, vector<2x1024xf32>
    %cst = arith.constant 5.000000e-01 : f32
    %1 = vector.broadcast %cst : f32 to vector<2x1024xf32>
    %2 = arith.mulf %1, %0 : vector<2x1024xf32>
    %cst_1 = arith.constant 4.471500e-02 : f32
    %3 = vector.broadcast %cst_1 : f32 to vector<2x1024xf32>
    %4 = arith.mulf %3, %0 : vector<2x1024xf32>
    %5 = arith.mulf %4, %0 : vector<2x1024xf32>
    %6 = arith.mulf %5, %0 : vector<2x1024xf32>
    %7 = arith.addf %0, %6 : vector<2x1024xf32>
    %cst_2 = arith.constant 0.797884583 : f32
    %8 = vector.broadcast %cst_2 : f32 to vector<2x1024xf32>
    %9 = arith.mulf %8, %7 : vector<2x1024xf32>
    %10 = math.tanh %9 : vector<2x1024xf32>
    %cst_3 = arith.constant 1.000000e+00 : f32
    %11 = vector.broadcast %cst_3 : f32 to vector<2x1024xf32>
    %12 = arith.addf %11, %10 : vector<2x1024xf32>
    %13 = arith.mulf %2, %12 : vector<2x1024xf32>
    %c0_4 = arith.constant 0 : index
    %c0_5 = arith.constant 0 : index
    %14 = vector.load %arg2[%c0_4, %c0_5] : memref<2x1024xf32, #tpu.memory_space<vmem>>, vector<2x1024xf32>
    tpu.vector_store %arg2[%c0_4, %c0_5], %13 {strides = array<i32>} : memref<2x1024xf32, #tpu.memory_space<vmem>>, vector<2x1024xf32>,
    return
  }
  func.func @transform_0(%arg0: i32) -> (i32, i32) {
    %c0_i32 = arith.constant 0 : i32
    %c0_i32_0 = arith.constant 0 : i32
    return %arg0, %c0_i32 : i32, i32
  }
  func.func @transform_1(%arg0: i32) -> (i32, i32) {
    %c0_i32 = arith.constant 0 : i32
    %c0_i32_0 = arith.constant 0 : i32
    return %arg0, %c0_i32 : i32, i32
  }
}

</mosaic_0001>

<bundles_post_ra>
// kernel: apply_module.1
= control target key start
LH: loop header
LB: loop body
LE: loop exit
PB: predicated region body
PF: predicated region fallthrough
CT: control target
= control target key end

     0   :  { %s60_s0 = inlined_call_operand.vmem [shape: f32[2,1024], index: 0, kind: input, shape index: {}]   ;;  %s61_s1 = inlined_call_operand.vmem [shape: f32[2,1024], index: 1, kind: output, shape index: {}]  }
   0x1   :  { %v8_v0 = vld [vmem:[%s60_s0] sm:$0xff]  ;;  %v9_v1 = vld [vmem:[%s60_s0 + $0x8] sm:$0xff] }
   0x2   :  { %v12_v2 = vmul.f32 0.044715, %v8_v0  ;;  %v13_v3 = vmul.f32 0.044715, %v9_v1  ;;  %v10_v12 = vmul.f32 0.5, %v8_v0  ;;  %v11_v14 = vmul.f32 0.5, %v9_v1 }
   0x4   :  { %v14_v4 = vmul.f32 %v12_v2, %v8_v0  ;;  %v15_v5 = vmul.f32 %v13_v3, %v9_v1 }
   0x6   :  { %v16_v6 = vmul.f32 %v14_v4, %v8_v0  ;;  %v17_v7 = vmul.f32 %v15_v5, %v9_v1 }
   0x8   :  { %v18_v8 = vadd.f32 %v16_v6, %v8_v0  ;;  %v19_v9 = vadd.f32 %v17_v7, %v9_v1 }
   0xa   :  { %v20_v10 = vmul.f32 0.7978846, %v18_v8  ;;  %v21_v11 = vmul.f32 0.7978846, %v19_v9 }
   0xc   :  { %34 = vtanh.f32 %v20_v10 }
   0xd   :  { %36 = vtanh.f32 %v21_v11 }
  0x16   :  { %v35_v13 = vpop.eup %34 }
  0x17   :  { %v37_v15 = vpop.eup %36  ;;  %v24_v16 = vadd.f32 1.0, %v35_v13 }
  0x18   :  { %v25_v17 = vadd.f32 1.0, %v37_v15 }
  0x19   :  { %v26_v18 = vmul.f32 %v24_v16, %v10_v12 }
  0x1a   :  { %v27_v19 = vmul.f32 %v25_v17, %v11_v14 }
  0x1b   :  { %28 = vst [vmem:[%s61_s1] sm:$0xff] %v26_v18 }
  0x1c   :  { %29 = vst [vmem:[%s61_s1 + $0x8] sm:$0xff] %v27_v19 }

</bundles_post_ra>
